<compile_context>
chip_gen: v7x
topology: tpu7x:2x2x1
jax: 0.10.0
libtpu: 0.0.40
codegen_flags: <defaults>
</compile_context>

<pallas_src>
import functools

import jax
import jax.numpy as jnp
from jax.experimental import pallas as pl
from jax.experimental.pallas import tpu as pltpu

EPS = 1e-5


def _round_up(x, m):
    return ((x + m - 1) // m) * m


# ---------------- Pass 1: Linear + mask, per-tile partial sums (parallel) ----------------
def _stats_kernel(x_ref, m_ref, w_ref, b_ref, sum_ref, sumsq_ref, cnt_ref, *, n_tokens):
    # x_ref: (tn, Din) f32    m_ref: (tn, 1) f32
    # w_ref: (Din, Dout) bf16 b_ref: (1, Dout) f32
    # sum_ref / sumsq_ref: (8, Dout) f32, cnt_ref: (8, 1) f32 -- per-tile partials.
    tn = x_ref.shape[0]
    dout = w_ref.shape[1]

    # Row-validity mask for the (possibly partial) tail tile: out-of-bounds rows of the
    # block may contain garbage, so select (not multiply) them to exact zero.
    row = jax.lax.broadcasted_iota(jnp.int32, (tn, 1), 0) + pl.program_id(0) * tn
    valid = row < n_tokens

    y = jnp.dot(x_ref[...].astype(jnp.bfloat16), w_ref[...],
                preferred_element_type=jnp.float32)
    y = jnp.where(valid, (y + b_ref[...]) * m_ref[...], 0.0)          # masked linear out
    mv = jnp.where(valid, m_ref[...], 0.0)                            # masked count src

    s = jnp.sum(y, axis=0, keepdims=True)                             # (1, Dout)
    ss = jnp.sum(y * y, axis=0, keepdims=True)                        # (1, Dout)
    c = jnp.sum(mv, axis=0, keepdims=True)                            # (1, 1)

    # Store the partial sums broadcast across the 8 sublanes (all rows identical); the
    # wrapper reads row 0 of each tile's block.
    sum_ref[...] = jnp.broadcast_to(s, sum_ref.shape)
    sumsq_ref[...] = jnp.broadcast_to(ss, sumsq_ref.shape)
    cnt_ref[...] = jnp.broadcast_to(c, cnt_ref.shape)


# ------------- Pass 2: recompute Linear + mask, fused BN affine + ReLU, store -------------
def _apply_kernel(x_ref, m_ref, w_ref, b_ref, scale_ref, shift_ref, o_ref):
    y = jnp.dot(x_ref[...].astype(jnp.bfloat16), w_ref[...],
                preferred_element_type=jnp.float32)
    y = (y + b_ref[...]) * m_ref[...]
    o_ref[...] = jnp.maximum(y * scale_ref[...] + shift_ref[...], 0.0).astype(o_ref.dtype)


def prepare_params(w, b, gamma, beta):
    """One-time (outside the hot path) param prep: transpose + bf16 cast of W only.
    No Dout padding (Dout=32 is kept as the true lane width of the output)."""
    w_p = jnp.asarray(w, jnp.float32).T.astype(jnp.bfloat16)          # (Din, Dout)
    b_p = jnp.asarray(b, jnp.float32).reshape(1, -1)                  # (1, Dout)
    g_p = jnp.asarray(gamma, jnp.float32).reshape(1, -1)
    be_p = jnp.asarray(beta, jnp.float32).reshape(1, -1)
    return {"w": w_p, "b": b_p, "gamma": g_p, "beta": be_p}


@functools.partial(jax.jit, static_argnames=("tile_n",))
def attr_embedding_forward(x, mask, w_p, b_p, gamma_p, beta_p, *, tile_n=1024):
    """x: (B, L, Din) f32, mask: (B, L, 1). Params from prepare_params().

    Returns (relu(masked_batchnorm(mask * linear(x))), mask)."""
    B, L, Din = x.shape
    Dout = w_p.shape[1]
    N = B * L

    # Token tiling: large tiles (default 1024) to amortize grid-step overhead; clamp
    # for tiny inputs, always a multiple of 8 (sublane) unless it equals N.
    tn = min(tile_n, _round_up(N, 8))
    grid_n = pl.cdiv(N, tn)

    xf = x.reshape(N, Din)                      # free reshape; f32 streamed, bf16 in-kernel
    mf = mask.reshape(N, 1).astype(jnp.float32)

    parallel = pltpu.CompilerParams(dimension_semantics=("parallel",))

    # ---- Pass 1: per-tile partial sum / sum-of-squares / masked count ----
    sum_p, sumsq_p, cnt_p = pl.pallas_call(
        functools.partial(_stats_kernel, n_tokens=N),
        out_shape=(
            jax.ShapeDtypeStruct((grid_n * 8, Dout), jnp.float32),
            jax.ShapeDtypeStruct((grid_n * 8, Dout), jnp.float32),
            jax.ShapeDtypeStruct((grid_n * 8, 1), jnp.float32),
        ),
        grid_spec=pltpu.PrefetchScalarGridSpec(
            num_scalar_prefetch=0,
            grid=(grid_n,),
            in_specs=[
                pl.BlockSpec((tn, Din), lambda i: (i, 0)),
                pl.BlockSpec((tn, 1), lambda i: (i, 0)),
                pl.BlockSpec((Din, Dout), lambda i: (0, 0)),
                pl.BlockSpec((1, Dout), lambda i: (0, 0)),
            ],
            out_specs=[
                pl.BlockSpec((8, Dout), lambda i: (i, 0)),
                pl.BlockSpec((8, Dout), lambda i: (i, 0)),
                pl.BlockSpec((8, 1), lambda i: (i, 0)),
            ],
        ),
        compiler_params=parallel,
    )(xf, mf, w_p, b_p)

    # ---- Combine stats (tiny, plain JAX): fold BN into a single scale/shift FMA ----
    sum_y = jnp.sum(sum_p.reshape(grid_n, 8, Dout)[:, 0, :], axis=0)     # (Dout,)
    sumsq = jnp.sum(sumsq_p.reshape(grid_n, 8, Dout)[:, 0, :], axis=0)   # (Dout,)
    n = jnp.maximum(jnp.sum(cnt_p.reshape(grid_n, 8, 1)[:, 0, :]), 1.0)  # guard all-masked
    inv_n = 1.0 / n
    mean = sum_y * inv_n
    var = jnp.maximum(sumsq * inv_n - mean * mean, 0.0)
    rstd = jax.lax.rsqrt(var + EPS)
    scale = (gamma_p[0] * rstd).reshape(1, Dout)
    shift = (beta_p[0] - mean * gamma_p[0] * rstd).reshape(1, Dout)

    # ---- Pass 2: recompute cheap K=20 matmul, fused BN affine + ReLU, exact-width store ----
    out_flat = pl.pallas_call(
        _apply_kernel,
        out_shape=jax.ShapeDtypeStruct((N, Dout), jnp.float32),
        grid_spec=pltpu.PrefetchScalarGridSpec(
            num_scalar_prefetch=0,
            grid=(grid_n,),
            in_specs=[
                pl.BlockSpec((tn, Din), lambda i: (i, 0)),
                pl.BlockSpec((tn, 1), lambda i: (i, 0)),
                pl.BlockSpec((Din, Dout), lambda i: (0, 0)),
                pl.BlockSpec((1, Dout), lambda i: (0, 0)),
                pl.BlockSpec((1, Dout), lambda i: (0, 0)),
                pl.BlockSpec((1, Dout), lambda i: (0, 0)),
            ],
            out_specs=pl.BlockSpec((tn, Dout), lambda i: (i, 0)),
        ),
        compiler_params=parallel,
    )(xf, mf, w_p, b_p, scale, shift)

    return out_flat.reshape(B, L, Dout), mask


def _reference(x, mask, w, b, gamma, beta):
    """Pure-JAX reference mirroring the PyTorch forward (matmul inputs cast to bf16
    to match the kernel's MXU precision; all BN math in f32)."""
    B, L, Din = x.shape
    y = jnp.dot(
        x.reshape(B * L, Din).astype(jnp.bfloat16),
        w.T.astype(jnp.bfloat16),
        preferred_element_type=jnp.float32,
    ).reshape(B, L, -1) + b
    y = y * mask
    n = jnp.sum(mask)
    mean = jnp.sum(y, axis=(0, 1), keepdims=True) / n
    diff = (y - mean) * mask
    var = jnp.sum(diff * diff, axis=(0, 1), keepdims=True) / n
    out = (y - mean) * jax.lax.rsqrt(var + EPS) * gamma + beta
    return jnp.maximum(out, 0.0), mask


if __name__ == "__main__":
    B, L, Din, Dout = 2, 8, 20, 32

    key = jax.random.PRNGKey(0)
    kx, km, kw, kb, kg = jax.random.split(key, 5)

    x = jax.random.normal(kx, (B, L, Din), dtype=jnp.float32)
    mask = (jax.random.uniform(km, (B, L, 1)) > 0.3).astype(jnp.float32)
    mask = mask.at[:, 0, :].set(1.0)  # guarantee at least one valid token

    # Deterministic synthetic params (shapes match nn.Linear / BatchNorm1d)
    bound = 1.0 / jnp.sqrt(float(Din))
    w = jax.random.uniform(kw, (Dout, Din), minval=-bound, maxval=bound, dtype=jnp.float32)
    b = jax.random.uniform(kb, (Dout,), minval=-bound, maxval=bound, dtype=jnp.float32)
    gamma = 1.0 + 0.1 * jax.random.normal(kg, (Dout,), dtype=jnp.float32)
    beta = 0.01 * jnp.arange(Dout, dtype=jnp.float32)

    params = prepare_params(w, b, gamma, beta)  # one-time prep (transpose/cast)

    out, mask_out = attr_embedding_forward(
        x, mask, params["w"], params["b"], params["gamma"], params["beta"])
    out = jax.block_until_ready(out)

    ref, _ = _reference(x, mask, w, b, gamma, beta)
    assert out.shape == (B, L, Dout)
    assert jnp.allclose(out, ref, atol=2e-3, rtol=2e-3), (
        "mismatch vs reference, max abs diff "
        f"{float(jnp.max(jnp.abs(out - ref)))}")

    print("KERNEL_OK")
</pallas_src>

<mosaic_0001>
module attributes {stable_mosaic.version = 11 : i64} {
  func.func @_stats_kernel(%arg0: i32, %arg1: memref<16x20xf32, #tpu.memory_space<vmem>>, %arg2: memref<16x1xf32, #tpu.memory_space<vmem>>, %arg3: memref<20x32xbf16, #tpu.memory_space<vmem>>, %arg4: memref<1x32xf32, #tpu.memory_space<vmem>>, %arg5: memref<8x32xf32, #tpu.memory_space<vmem>>, %arg6: memref<8x32xf32, #tpu.memory_space<vmem>>, %arg7: memref<8x1xf32, #tpu.memory_space<vmem>>) attributes {dimension_semantics = [#tpu.dimension_semantics<parallel>], iteration_bounds = array<i64: 1>, scalar_prefetch = 0 : i64, scratch_operands = 0 : i64, tpu.core_type = #tpu.core_type<tc>, window_params = [{transform_indices = @transform_0, window_bounds = array<i64: 16, 20>}, {transform_indices = @transform_1, window_bounds = array<i64: 16, 1>}, {pipeline_mode = #tpu.pipeline_mode<synchronous>, transform_indices = @transform_2, window_bounds = array<i64: 20, 32>}, {pipeline_mode = #tpu.pipeline_mode<synchronous>, transform_indices = @transform_3, window_bounds = array<i64: 1, 32>}, {transform_indices = @transform_4, window_bounds = array<i64: 8, 32>}, {transform_indices = @transform_5, window_bounds = array<i64: 8, 32>}, {transform_indices = @transform_6, window_bounds = array<i64: 8, 1>}]} {
    %0 = tpu.iota {dimensions = array<i32: 0>} : vector<16x1xi32>
    %c16_i32 = arith.constant 16 : i32
    %1 = arith.muli %arg0, %c16_i32 : i32
    %2 = vector.broadcast %1 : i32 to vector<16x1xi32>
    %3 = arith.addi %0, %2 : vector<16x1xi32>
    %c16_i32_0 = arith.constant 16 : i32
    %4 = vector.broadcast %c16_i32_0 : i32 to vector<16x1xi32>
    %5 = arith.cmpi slt, %3, %4 : vector<16x1xi32>
    %c0 = arith.constant 0 : index
    %c0_1 = arith.constant 0 : index
    %6 = vector.load %arg1[%c0, %c0_1] : memref<16x20xf32, #tpu.memory_space<vmem>>, vector<16x20xf32>
    %7 = arith.truncf %6 : vector<16x20xf32> to vector<16x20xbf16>
    %c0_2 = arith.constant 0 : index
    %c0_3 = arith.constant 0 : index
    %8 = vector.load %arg3[%c0_2, %c0_3] : memref<20x32xbf16, #tpu.memory_space<vmem>>, vector<20x32xbf16>
    %cst = arith.constant dense<0.000000e+00> : vector<16x32xf32>
    %9 = tpu.matmul %7, %8, %cst {dimension_numbers = #tpu.dot_dimension_numbers<[1], [0], [0], [1], [0, 0, 1, 1], [], []>} : vector<16x20xbf16>, vector<20x32xbf16>, vector<16x32xf32> -> vector<16x32xf32>
    %c0_4 = arith.constant 0 : index
    %c0_5 = arith.constant 0 : index
    %10 = vector.load %arg4[%c0_4, %c0_5] : memref<1x32xf32, #tpu.memory_space<vmem>>, vector<1x32xf32>
    %11 = vector.broadcast %10 : vector<1x32xf32> to vector<16x32xf32>
    %12 = arith.addf %9, %11 : vector<16x32xf32>
    %c0_6 = arith.constant 0 : index
    %c0_7 = arith.constant 0 : index
    %13 = vector.load %arg2[%c0_6, %c0_7] : memref<16x1xf32, #tpu.memory_space<vmem>>, vector<16x1xf32>
    %14 = vector.broadcast %13 : vector<16x1xf32> to vector<16x32xf32>
    %15 = arith.mulf %12, %14 : vector<16x32xf32>
    %cst_8 = arith.constant 0.000000e+00 : f32
    %16 = vector.shape_cast %5 : vector<16x1xi1> to vector<16x1xi1>
    %17 = vector.broadcast %16 : vector<16x1xi1> to vector<16x32xi1>
    %18 = vector.broadcast %cst_8 : f32 to vector<16x32xf32>
    %19 = arith.select %17, %15, %18 : vector<16x32xi1>, vector<16x32xf32>
    %c0_9 = arith.constant 0 : index
    %c0_10 = arith.constant 0 : index
    %20 = vector.load %arg2[%c0_9, %c0_10] : memref<16x1xf32, #tpu.memory_space<vmem>>, vector<16x1xf32>
    %cst_11 = arith.constant 0.000000e+00 : f32
    %21 = vector.broadcast %cst_11 : f32 to vector<16x1xf32>
    %22 = arith.select %5, %20, %21 : vector<16x1xi1>, vector<16x1xf32>
    %cst_12 = arith.constant dense<0.000000e+00> : vector<32xf32>
    %23 = vector.multi_reduction <add>, %19, %cst_12 [0] : vector<16x32xf32> to vector<32xf32>
    %24 = vector.shape_cast %23 : vector<32xf32> to vector<1x32xf32>
    %25 = arith.mulf %19, %19 : vector<16x32xf32>
    %cst_13 = arith.constant dense<0.000000e+00> : vector<32xf32>
    %26 = vector.multi_reduction <add>, %25, %cst_13 [0] : vector<16x32xf32> to vector<32xf32>
    %27 = vector.shape_cast %26 : vector<32xf32> to vector<1x32xf32>
    %cst_14 = arith.constant dense<0.000000e+00> : vector<1xf32>
    %28 = vector.multi_reduction <add>, %22, %cst_14 [0] : vector<16x1xf32> to vector<1xf32>
    %29 = vector.shape_cast %28 : vector<1xf32> to vector<1x1xf32>
    %30 = vector.shape_cast %24 : vector<1x32xf32> to vector<1x32xf32>
    %31 = vector.broadcast %30 : vector<1x32xf32> to vector<8x32xf32>
    %c0_15 = arith.constant 0 : index
    %c0_16 = arith.constant 0 : index
    %32 = vector.load %arg5[%c0_15, %c0_16] : memref<8x32xf32, #tpu.memory_space<vmem>>, vector<8x32xf32>
    tpu.vector_store %arg5[%c0_15, %c0_16], %31 {strides = array<i32>} : memref<8x32xf32, #tpu.memory_space<vmem>>, vector<8x32xf32>,
    %33 = vector.shape_cast %27 : vector<1x32xf32> to vector<1x32xf32>
    %34 = vector.broadcast %33 : vector<1x32xf32> to vector<8x32xf32>
    %c0_17 = arith.constant 0 : index
    %c0_18 = arith.constant 0 : index
    %35 = vector.load %arg6[%c0_17, %c0_18] : memref<8x32xf32, #tpu.memory_space<vmem>>, vector<8x32xf32>
    tpu.vector_store %arg6[%c0_17, %c0_18], %34 {strides = array<i32>} : memref<8x32xf32, #tpu.memory_space<vmem>>, vector<8x32xf32>,
    %36 = vector.shape_cast %29 : vector<1x1xf32> to vector<1x1xf32>
    %37 = vector.broadcast %36 : vector<1x1xf32> to vector<8x1xf32>
    %c0_19 = arith.constant 0 : index
    %c0_20 = arith.constant 0 : index
    %38 = vector.load %arg7[%c0_19, %c0_20] : memref<8x1xf32, #tpu.memory_space<vmem>>, vector<8x1xf32>
    tpu.vector_store %arg7[%c0_19, %c0_20], %37 {strides = array<i32>} : memref<8x1xf32, #tpu.memory_space<vmem>>, vector<8x1xf32>,
    return
  }
  func.func @transform_0(%arg0: i32) -> (i32, i32) {
    %c0_i32 = arith.constant 0 : i32
    %c0_i32_0 = arith.constant 0 : i32
    return %arg0, %c0_i32 : i32, i32
  }
  func.func @transform_1(%arg0: i32) -> (i32, i32) {
    %c0_i32 = arith.constant 0 : i32
    %c0_i32_0 = arith.constant 0 : i32
    return %arg0, %c0_i32 : i32, i32
  }
  func.func @transform_2(%arg0: i32) -> (i32, i32) {
    %c0_i32 = arith.constant 0 : i32
    %c0_i32_0 = arith.constant 0 : i32
    %c0_i32_1 = arith.constant 0 : i32
    return %c0_i32, %c0_i32_0 : i32, i32
  }
  func.func @transform_3(%arg0: i32) -> (i32, i32) {
    %c0_i32 = arith.constant 0 : i32
    %c0_i32_0 = arith.constant 0 : i32
    %c0_i32_1 = arith.constant 0 : i32
    return %c0_i32, %c0_i32_0 : i32, i32
  }
  func.func @transform_4(%arg0: i32) -> (i32, i32) {
    %c0_i32 = arith.constant 0 : i32
    %c0_i32_0 = arith.constant 0 : i32
    return %arg0, %c0_i32 : i32, i32
  }
  func.func @transform_5(%arg0: i32) -> (i32, i32) {
    %c0_i32 = arith.constant 0 : i32
    %c0_i32_0 = arith.constant 0 : i32
    return %arg0, %c0_i32 : i32, i32
  }
  func.func @transform_6(%arg0: i32) -> (i32, i32) {
    %c0_i32 = arith.constant 0 : i32
    %c0_i32_0 = arith.constant 0 : i32
    return %arg0, %c0_i32 : i32, i32
  }
}

module attributes {stable_mosaic.version = 11 : i64} {
  func.func @_apply_kernel(%arg0: i32, %arg1: memref<16x20xf32, #tpu.memory_space<vmem>>, %arg2: memref<16x1xf32, #tpu.memory_space<vmem>>, %arg3: memref<20x32xbf16, #tpu.memory_space<vmem>>, %arg4: memref<1x32xf32, #tpu.memory_space<vmem>>, %arg5: memref<1x32xf32, #tpu.memory_space<vmem>>, %arg6: memref<1x32xf32, #tpu.memory_space<vmem>>, %arg7: memref<16x32xf32, #tpu.memory_space<vmem>>) attributes {dimension_semantics = [#tpu.dimension_semantics<parallel>], iteration_bounds = array<i64: 1>, scalar_prefetch = 0 : i64, scratch_operands = 0 : i64, tpu.core_type = #tpu.core_type<tc>, window_params = [{transform_indices = @transform_0, window_bounds = array<i64: 16, 20>}, {transform_indices = @transform_1, window_bounds = array<i64: 16, 1>}, {pipeline_mode = #tpu.pipeline_mode<synchronous>, transform_indices = @transform_2, window_bounds = array<i64: 20, 32>}, {pipeline_mode = #tpu.pipeline_mode<synchronous>, transform_indices = @transform_3, window_bounds = array<i64: 1, 32>}, {pipeline_mode = #tpu.pipeline_mode<synchronous>, transform_indices = @transform_4, window_bounds = array<i64: 1, 32>}, {pipeline_mode = #tpu.pipeline_mode<synchronous>, transform_indices = @transform_5, window_bounds = array<i64: 1, 32>}, {transform_indices = @transform_6, window_bounds = array<i64: 16, 32>}]} {
    %c0 = arith.constant 0 : index
    %c0_0 = arith.constant 0 : index
    %0 = vector.load %arg1[%c0, %c0_0] : memref<16x20xf32, #tpu.memory_space<vmem>>, vector<16x20xf32>
    %1 = arith.truncf %0 : vector<16x20xf32> to vector<16x20xbf16>
    %c0_1 = arith.constant 0 : index
    %c0_2 = arith.constant 0 : index
    %2 = vector.load %arg3[%c0_1, %c0_2] : memref<20x32xbf16, #tpu.memory_space<vmem>>, vector<20x32xbf16>
    %cst = arith.constant dense<0.000000e+00> : vector<16x32xf32>
    %3 = tpu.matmul %1, %2, %cst {dimension_numbers = #tpu.dot_dimension_numbers<[1], [0], [0], [1], [0, 0, 1, 1], [], []>} : vector<16x20xbf16>, vector<20x32xbf16>, vector<16x32xf32> -> vector<16x32xf32>
    %c0_3 = arith.constant 0 : index
    %c0_4 = arith.constant 0 : index
    %4 = vector.load %arg4[%c0_3, %c0_4] : memref<1x32xf32, #tpu.memory_space<vmem>>, vector<1x32xf32>
    %5 = vector.broadcast %4 : vector<1x32xf32> to vector<16x32xf32>
    %6 = arith.addf %3, %5 : vector<16x32xf32>
    %c0_5 = arith.constant 0 : index
    %c0_6 = arith.constant 0 : index
    %7 = vector.load %arg2[%c0_5, %c0_6] : memref<16x1xf32, #tpu.memory_space<vmem>>, vector<16x1xf32>
    %8 = vector.broadcast %7 : vector<16x1xf32> to vector<16x32xf32>
    %9 = arith.mulf %6, %8 : vector<16x32xf32>
    %c0_7 = arith.constant 0 : index
    %c0_8 = arith.constant 0 : index
    %10 = vector.load %arg5[%c0_7, %c0_8] : memref<1x32xf32, #tpu.memory_space<vmem>>, vector<1x32xf32>
    %11 = vector.broadcast %10 : vector<1x32xf32> to vector<16x32xf32>
    %12 = arith.mulf %9, %11 : vector<16x32xf32>
    %c0_9 = arith.constant 0 : index
    %c0_10 = arith.constant 0 : index
    %13 = vector.load %arg6[%c0_9, %c0_10] : memref<1x32xf32, #tpu.memory_space<vmem>>, vector<1x32xf32>
    %14 = vector.broadcast %13 : vector<1x32xf32> to vector<16x32xf32>
    %15 = arith.addf %12, %14 : vector<16x32xf32>
    %cst_11 = arith.constant 0.000000e+00 : f32
    %16 = vector.broadcast %cst_11 : f32 to vector<16x32xf32>
    %17 = arith.maximumf %15, %16 : vector<16x32xf32>
    %c0_12 = arith.constant 0 : index
    %c0_13 = arith.constant 0 : index
    %18 = vector.load %arg7[%c0_12, %c0_13] : memref<16x32xf32, #tpu.memory_space<vmem>>, vector<16x32xf32>
    tpu.vector_store %arg7[%c0_12, %c0_13], %17 {strides = array<i32>} : memref<16x32xf32, #tpu.memory_space<vmem>>, vector<16x32xf32>,
    return
  }
  func.func @transform_0(%arg0: i32) -> (i32, i32) {
    %c0_i32 = arith.constant 0 : i32
    %c0_i32_0 = arith.constant 0 : i32
    return %arg0, %c0_i32 : i32, i32
  }
  func.func @transform_1(%arg0: i32) -> (i32, i32) {
    %c0_i32 = arith.constant 0 : i32
    %c0_i32_0 = arith.constant 0 : i32
    return %arg0, %c0_i32 : i32, i32
  }
  func.func @transform_2(%arg0: i32) -> (i32, i32) {
    %c0_i32 = arith.constant 0 : i32
    %c0_i32_0 = arith.constant 0 : i32
    %c0_i32_1 = arith.constant 0 : i32
    return %c0_i32, %c0_i32_0 : i32, i32
  }
  func.func @transform_3(%arg0: i32) -> (i32, i32) {
    %c0_i32 = arith.constant 0 : i32
    %c0_i32_0 = arith.constant 0 : i32
    %c0_i32_1 = arith.constant 0 : i32
    return %c0_i32, %c0_i32_0 : i32, i32
  }
  func.func @transform_4(%arg0: i32) -> (i32, i32) {
    %c0_i32 = arith.constant 0 : i32
    %c0_i32_0 = arith.constant 0 : i32
    %c0_i32_1 = arith.constant 0 : i32
    return %c0_i32, %c0_i32_0 : i32, i32
  }
  func.func @transform_5(%arg0: i32) -> (i32, i32) {
    %c0_i32 = arith.constant 0 : i32
    %c0_i32_0 = arith.constant 0 : i32
    %c0_i32_1 = arith.constant 0 : i32
    return %c0_i32, %c0_i32_0 : i32, i32
  }
  func.func @transform_6(%arg0: i32) -> (i32, i32) {
    %c0_i32 = arith.constant 0 : i32
    %c0_i32_0 = arith.constant 0 : i32
    return %arg0, %c0_i32 : i32, i32
  }
}

</mosaic_0001>

<bundles_post_ra>
// kernel: mul.3
= control target key start
LH: loop header
LB: loop body
LE: loop exit
PB: predicated region body
PF: predicated region fallthrough
CT: control target
= control target key end

     0   :  { %s34_s0 = inlined_call_operand.vmem [shape: f32[1,32], index: 0, kind: input, shape index: {}]   ;;  %s35_s1 = inlined_call_operand.vmem [shape: f32[1,32], index: 1, kind: input, shape index: {}]   ;;  %s36_s2 = inlined_call_operand.vmem [shape: f32[1,32], index: 2, kind: output, shape index: {}]  }
   0x1   :  { %v3_v0 = vld [vmem:[%s34_s0] sm:$0x1] }
   0x2   :  { %v4_v1 = vld [vmem:[%s35_s1] sm:$0x1] }
   0x3   :  { %v7_v2 = vmul.f32 %v4_v1, %v3_v0 }
   0x5   :  { %9 = vst [vmem:[%s36_s2] sm:$0x1] %v7_v2 }

// kernel: attr_embedding_forward.3
= control target key start
LH: loop header
LB: loop body
LE: loop exit
PB: predicated region body
PF: predicated region fallthrough
CT: control target
= control target key end

     0   :  { %v199_v1 = vmov 0.0   ;;  %vm51_vm0 = vcmask 1041408   ;;  %vm200_vm1 = vmmov 0   ;;  %s279_s0 = inlined_call_operand.vmem [shape: f32[16,20], index: 0, kind: input, shape index: {}]   ;;  %s280_s1 = inlined_call_operand.vmem [shape: f32[16,1], index: 1, kind: input, shape index: {}]   ;;  %s281_s2 = inlined_call_operand.vmem [shape: bf16[20,32], index: 2, kind: input, shape index: {}]   ;;  %s282_s3 = inlined_call_operand.vmem [shape: f32[1,32], index: 3, kind: input, shape index: {}]   ;;  %s283_s4 = inlined_call_operand.vmem [shape: f32[1,32], index: 4, kind: input, shape index: {}]   ;;  %s284_s5 = inlined_call_operand.vmem [shape: f32[1,32], index: 5, kind: input, shape index: {}]   ;;  %s285_s6 = inlined_call_operand.hbm [shape: f32[16,32], index: 6, kind: output, shape index: {}]  }
   0x1   :  { %v173_v0 = vld [vmem:[%s281_s2] sm:$0xff]   ;;  %158 = vmatprep.subr.bf16.mxu0 %v199_v1  ;;  %v174_v2 = vld [vmem:[%s281_s2 + $0x8] ss:$0 sps:$4 sm:$0x33]   ;;  %162 = vmatprep.mubr.msk.bf16.mxu0 %vm200_vm1, %v199_v1 }
   0x2   :  { %159 = vmatpush3.bf16.msra.mxu0 %v173_v0  ;;  %v25_v3 = vld [vmem:[%s279_s0] sm:$0xff]  ;;  %v26_v4 = vld [vmem:[%s279_s0 + $0x8] sm:$0xff]  ;;  %v53_v6 = vsel %vm51_vm0, %v174_v2, 0 }
   0x3   :  { %v96_v5 = vld [vmem:[%s280_s1] sm:$0xff]  ;;  %160 = vmatprep.subr.bf16.mxu0 %v199_v1 }
   0x4   :  { %11 = vsyncpa [#allocation3], 0  ;;  %v201_v7 = vmov 0   ;;  %v27_v8 = vpack.c.bf16 %v26_v4, %v25_v3  ;;  %vm47_vm2 = vcmask 162816   ;;  %v97_v9 = vld [vmem:[%s280_s1 + $0x8] sm:$0xff]  ;;  %vm130_vm3 = vcmask 261120  }
   0x5   :  { %172 = vset.pattern.permute.xlu0 %v201_v7  ;;  %v149_v11 = vld [vmem:[%s282_s3] ss:$0 sm:$0xff]  ;;  %s202_s3 = smov [#allocation2]  }
   0x6   :  { %100 = vperm.xlu0 %172, %v96_v5   ;;  %161 = vmatpush3.bf16.msra.mxu0 %v53_v6  ;;  %v153_v15 = vld [vmem:[%s283_s4] ss:$0 sm:$0xff]  ;;  %s138_s12 = sshll.u32 %s202_s3, 4  ;;  %s139_s12 = int_to_ptr.vmem [resolvable:$true] %s138_s12 }
   0x7   :  { %v154_v21 = vld [vmem:[%s284_s5] ss:$0 sm:$0xff]  ;;  %s175_s4 = scalar_lea.vmem %s139_s12, 256  ;;  %p180_p1 = scmp.lt.s32.totalorder %s139_s12, %s139_s12 }
   0x8   :  { %p176_p0 = scmp.ne.s32.totalorder %s139_s12, %s175_s4  ;;  %p181_p2 = scmp.lt.s32.totalorder %s175_s4, %s175_s4 }
   0x9   :  { %163 = vmatmul.mubr.msk.bf16.vlgmr.msra.gmra.mrb[0].mxu0 %vm47_vm2, %v27_v8 }
   0xa   :  { %105 = vperm.xlu0 %172, %v97_v9   ;;  %p182_p3 = por %p181_p2, %p180_p1 }
   0xc   :  { %p183_p4 = pnand %p182_p3, %p176_p0 }
  0x85   :  { %v101_v10 = vpop.permute.xlu0 %100 }
  0x89   :  { %v106_v20 = vpop.permute.xlu0 %105 }
  0xdc   :  { %v89_v12 = vpop.f32.mrb[0].mxu0 }
  0xdd   :  { %v90_v13 = vadd.f32 %v149_v11, %v89_v12  ;;  %v164_v14 = vpop.f32.mrb[1].mxu0 }
  0xde   :  { %v92_v16 = vpop.f32.mrb[2].mxu0 }
  0xdf   :  { %v108_v17 = vmul.f32 %v101_v10, %v90_v13  ;;  %v93_v18 = vadd.f32 %v149_v11, %v92_v16  ;;  %v165_v19 = vpop.f32.mrb[3].mxu0 }
  0xe1   :  { %v117_v22 = vmul.f32 %v153_v15, %v108_v17  ;;  %v109_v23 = vmul.f32 %v106_v20, %v93_v18 }
  0xe3   :  { %v126_v24 = vadd.f32 %v154_v21, %v117_v22  ;;  %v118_v25 = vmul.f32 %v153_v15, %v109_v23 }
  0xe5   :  { %v128_v26 = vmax.f32 %v126_v24, 0.0  ;;  %v127_v27 = vadd.f32 %v154_v21, %v118_v25 }
  0xe7   :  { %v129_v28 = vmax.f32 %v127_v27, 0.0  ;;  %131 = vst.msk [vmem:[#allocation2] sm:$0xff] %vm130_vm3, %v128_v26 }
  0xe9   :  { %132 = vst.msk [vmem:[#allocation2 + $0x8] sm:$0xff] %vm130_vm3, %v129_v28 }
  0xea   :  { %186 = shalt.err (!%p183_p4)
}
  0xeb   :  { %s187_s14 = scalar_lea.hbm %s285_s6, 256 }
  0xec   :  { %p188_p5 = scmp.ne.s32.totalorder %s285_s6, %s187_s14  ;;  %p191_p6 = scmp.lt.u32.totalorder %s187_s14, %s285_s6 }
  0xee   :  { %p193_p7 = pnand %p191_p6, %p188_p5 }
  0xf0   :  { %196 = shalt.err (!%p193_p7)
}
  0xf1   :  { %s203_s19 = smov 128   ;;  %s204_s20 = smov 8  }
  0xf2   :  { %144 = dma.vmem_to_hbm [thread:$0]  %s139_s12, 256, %s285_s6, [#allocation3], %s203_s19, %s203_s19, %s204_s20  }
  0xf3   :  { %197 = dma.done.wait [#allocation3], 256  }
  0xf4   :  { %198 = vsyncadd [#allocation3], 4294967040 }
  0xf5   :  { %148 = vsyncpa [#allocation3], 1 }

// kernel: attr_embedding_forward.2
= control target key start
LH: loop header
LB: loop body
LE: loop exit
PB: predicated region body
PF: predicated region fallthrough
CT: control target
= control target key end

     0   :  { %vm56_vm0 = vcmask 1041408   ;;  %v190_v0 = vmov 0.0   ;;  %vm191_vm1 = vmmov 0   ;;  %v192_v4 = vmov 0   ;;  %s268_s2 = inlined_call_operand.vmem [shape: bf16[20,32], index: 2, kind: input, shape index: {}]   ;;  %s269_s0 = inlined_call_operand.vmem [shape: f32[16,20], index: 0, kind: input, shape index: {}]   ;;  %s270_s1 = inlined_call_operand.vmem [shape: f32[16,1], index: 1, kind: input, shape index: {}]   ;;  %s271_s6 = inlined_call_operand.vmem [shape: f32[8,1], index: 6, kind: output, shape index: {2}]   ;;  %s272_s3 = inlined_call_operand.vmem [shape: f32[1,32], index: 3, kind: input, shape index: {}]   ;;  %s273_s4 = inlined_call_operand.vmem [shape: f32[8,32], index: 4, kind: output, shape index: {0}]   ;;  %s274_s5 = inlined_call_operand.vmem [shape: f32[8,32], index: 5, kind: output, shape index: {1}]  }
   0x1   :  { %176 = vmatprep.subr.bf16.mxu0 %v190_v0  ;;  %v188_v1 = vld [vmem:[%s268_s2] sm:$0xff]   ;;  %180 = vmatprep.mubr.msk.bf16.mxu0 %vm191_vm1, %v190_v0  ;;  %v189_v2 = vld [vmem:[%s268_s2 + $0x8] ss:$0 sps:$4 sm:$0x33]   ;;  %vm144_vm2 = vcmask 7168   ;;  %vm52_vm3 = vcmask 162816  }
   0x2   :  { %v30_v3 = vld [vmem:[%s269_s0] sm:$0xff]  ;;  %187 = vset.pattern.permute.xlu0 %v192_v4  ;;  %177 = vmatpush3.bf16.msra.mxu0 %v188_v1  ;;  %v31_v5 = vld [vmem:[%s269_s0 + $0x8] sm:$0xff]  ;;  %v58_v8 = vsel %vm56_vm0, %v189_v2, 0  ;;  %vm123_vm4 = vcmask 261120  }
   0x3   :  { %v101_v6 = vld [vmem:[%s270_s1] sm:$0xff]  ;;  %v102_v7 = vld [vmem:[%s270_s1 + $0x8] sm:$0xff]  ;;  %178 = vmatprep.subr.bf16.mxu0 %v190_v0  ;;  %v32_v12 = vpack.c.bf16 %v31_v5, %v30_v3 }
   0x4   :  { %105 = vperm.xlu0 %187, %v101_v6   ;;  %v145_v9 = vsel %vm144_vm2, %v101_v6, 0.0  ;;  %v146_v10 = vsel %vm144_vm2, %v102_v7, 0.0  ;;  %v169_v20 = vld [vmem:[%s272_s3] ss:$0 sm:$0xff] }
   0x5   :  { %v147_v11 = vadd.f32 %v146_v10, %v145_v9 }
   0x6   :  { %179 = vmatpush3.bf16.msra.mxu0 %v58_v8 }
   0x7   :  { %v148_v13 = vrot.slane %v147_v11, 4 }
   0x8   :  { %110 = vperm.xlu0 %187, %v102_v7  }
   0x9   :  { %v149_v14 = vadd.f32 %v148_v13, %v147_v11  ;;  %181 = vmatmul.mubr.msk.bf16.vlgmr.msra.gmra.mrb[0].mxu0 %vm52_vm3, %v32_v12 }
   0xb   :  { %v150_v15 = vrot.slane %v149_v14, 2 }
   0xd   :  { %v151_v16 = vadd.f32 %v150_v15, %v149_v14 }
   0xf   :  { %v152_v17 = vrot.slane %v151_v16, 1 }
  0x11   :  { %v153_v18 = vadd.f32 %v152_v17, %v151_v16 }
  0x13   :  { %156 = vst.msk [vmem:[%s271_s6] sm:$0xff] %vm144_vm2, %v153_v18 }
  0x83   :  { %v106_v19 = vpop.permute.xlu0 %105 }
  0x87   :  { %v111_v28 = vpop.permute.xlu0 %110 }
  0xdc   :  { %v94_v21 = vpop.f32.mrb[0].mxu0 }
  0xdd   :  { %v95_v22 = vadd.f32 %v169_v20, %v94_v21  ;;  %v182_v23 = vpop.f32.mrb[1].mxu0 }
  0xde   :  { %v97_v24 = vpop.f32.mrb[2].mxu0 }
  0xdf   :  { %v113_v25 = vmul.f32 %v106_v19, %v95_v22  ;;  %v98_v26 = vadd.f32 %v169_v20, %v97_v24  ;;  %v183_v27 = vpop.f32.mrb[3].mxu0 }
  0xe1   :  { %v133_v29 = vmul.f32 %v113_v25, %v113_v25  ;;  %v114_v30 = vmul.f32 %v111_v28, %v98_v26  ;;  %v124_v31 = vsel %vm123_vm4, %v113_v25, 0.0 }
  0xe3   :  { %v125_v32 = vsel %vm123_vm4, %v114_v30, 0.0  ;;  %v134_v33 = vmul.f32 %v114_v30, %v114_v30  ;;  %v135_v35 = vsel %vm123_vm4, %v133_v29, 0.0 }
  0xe4   :  { %v126_v34 = vadd.f32 %v125_v32, %v124_v31 }
  0xe5   :  { %v136_v36 = vsel %vm123_vm4, %v134_v33, 0.0 }
  0xe6   :  { %v127_v37 = vrot.slane %v126_v34, 4  ;;  %v137_v38 = vadd.f32 %v136_v36, %v135_v35 }
  0xe8   :  { %v128_v39 = vadd.f32 %v127_v37, %v126_v34  ;;  %v138_v40 = vrot.slane %v137_v38, 4 }
  0xea   :  { %v129_v41 = vrot.slane %v128_v39, 2  ;;  %v139_v42 = vadd.f32 %v138_v40, %v137_v38 }
  0xec   :  { %v130_v43 = vadd.f32 %v129_v41, %v128_v39  ;;  %v140_v44 = vrot.slane %v139_v42, 2 }
  0xee   :  { %v131_v45 = vrot.slane %v130_v43, 1  ;;  %v141_v46 = vadd.f32 %v140_v44, %v139_v42 }
  0xf0   :  { %v132_v47 = vadd.f32 %v131_v45, %v130_v43  ;;  %v142_v48 = vrot.slane %v141_v46, 1 }
  0xf2   :  { %v143_v49 = vadd.f32 %v142_v48, %v141_v46  ;;  %154 = vst.msk [vmem:[%s273_s4] sm:$0xff] %vm123_vm4, %v132_v47 }
  0xf4   :  { %155 = vst.msk [vmem:[%s274_s5] sm:$0xff] %vm123_vm4, %v143_v49 }

</bundles_post_ra>
